<compile_context>
chip_gen: v7x
topology: tpu7x:2x2x1
jax: 0.10.0
libtpu: 0.0.40
codegen_flags: <defaults>
</compile_context>

<pallas_src>
import functools

import jax
import jax.numpy as jnp
from jax.experimental import pallas as pl
from jax.experimental.pallas import tpu as pltpu


def _mog_nll_kernel(x_ref, neg_a_ref, b_ref, cpi_ref, out_ref, acc_ref, *,
                    n_valid, tile_n, tiles_per_chunk):
    c = pl.program_id(0)   # parallel chunk axis (maps to TensorCores on v7x)
    t = pl.program_id(1)   # arbitrary (accumulation) axis

    @pl.when(t == 0)
    def _init():
        acc_ref[...] = jnp.zeros_like(acc_ref)

    tile_start = (c * tiles_per_chunk + t) * tile_n

    # Skip the whole body for tiles entirely past the valid rows (can happen when
    # the chunk geometry rounds N up).
    @pl.when(tile_start < n_valid)
    def _compute():
        x = x_ref[...].astype(jnp.float32)                       # (TN, D)

        # z_nk = log_pi_k + log_N_nk via two MXU matmuls + precomputed constants.
        z = (cpi_ref[...]
             + jnp.dot(x * x, neg_a_ref[...], preferred_element_type=jnp.float32)
             + jnp.dot(x, b_ref[...], preferred_element_type=jnp.float32))  # (TN, Kp)

        # logsumexp over the (padded) mixture components; padded columns carry
        # -1e30 and vanish under exp.
        m = jnp.max(z, axis=1, keepdims=True)                    # (TN, 1)
        nll = -(m + jnp.log(jnp.sum(jnp.exp(z - m), axis=1, keepdims=True)))

        # Only the tile straddling n_valid pays for the row mask; interior tiles
        # do a plain VPU accumulate.
        @pl.when(tile_start + tile_n > n_valid)
        def _tail():
            rows = tile_start + jax.lax.broadcasted_iota(jnp.int32, (tile_n, 1), 0)
            acc_ref[...] += jnp.where(rows < n_valid, nll, 0.0)

        @pl.when(tile_start + tile_n <= n_valid)
        def _interior():
            acc_ref[...] += nll

    @pl.when(t == pl.num_programs(1) - 1)
    def _finalize():
        # Single cross-sublane reduce per chunk; lane-dense output block.
        out_ref[...] = jnp.broadcast_to(
            jnp.sum(acc_ref[...]).reshape(1, 1, 1), out_ref.shape)


def _chip_defaults():
    """(default num_chunks, VMEM-limit cap) keyed off the TPU generation."""
    try:
        kind = jax.devices()[0].device_kind.lower()
    except Exception:
        kind = ""
    if "v7" in kind:
        return 2, 48 * 1024 * 1024      # 2 TensorCores, 64 MiB physical VMEM
    return 1, 96 * 1024 * 1024          # v5e / v6e: 1 TC, 128 MiB physical VMEM


def mog_nll(x, mu, log_var, w, *, tile_n=None, num_chunks=None):
    """Mean NLL of x under a mixture of diagonal Gaussians (Pallas TPU kernel)."""
    N, D = x.shape
    K = mu.shape[0]

    mu = mu.astype(jnp.float32)
    lv = log_var.astype(jnp.float32)

    # ---- Hoisted parameter-only math (runs once, outside the grid loop) ----
    log_pi = jax.nn.log_softmax(w.reshape(1, K).astype(jnp.float32), axis=1)[0]  # (K,)
    a = 0.5 * jnp.exp(-lv)                                                       # (K, D)
    c = jnp.sum(-0.5 * jnp.log(2.0 * jnp.pi) - 0.5 * lv - a * mu * mu, axis=1)   # (K,)
    cpi = log_pi + c                                                             # (K,)

    # Pad K to a lane-dense multiple of 128; padded components contribute exp(-1e30)=0.
    Kp = ((K + 127) // 128) * 128
    neg_a = jnp.zeros((D, Kp), jnp.float32).at[:, :K].set(jnp.transpose(-a))
    b_mix = jnp.zeros((D, Kp), jnp.float32).at[:, :K].set(jnp.transpose(2.0 * a * mu))
    cpi_p = jnp.full((1, Kp), -1e30, jnp.float32).at[0, :K].set(cpi)

    # ---- Tile / chunk geometry ----
    default_chunks, vmem_cap = _chip_defaults()

    lane_d = max(128, ((D + 127) // 128) * 128)      # lane-padded feature width in VMEM
    if tile_n is None:
        # Target ~2 MiB of x per grid step so the ~0.35 us per-step overhead is
        # amortized; clamp to [256, 4096] and don't exceed (rounded-up) N.
        tile_n = (2 * 1024 * 1024) // (lane_d * 4)
        tile_n = int(max(256, min(4096, tile_n)))
        tile_n = (tile_n // 256) * 256
        tile_n = min(tile_n, max(256, ((N + 255) // 256) * 256))
    else:
        tile_n = int(tile_n)
        assert tile_n % 8 == 0, "tile_n must be a multiple of 8 (sublane)"

    num_tiles = max(1, (N + tile_n - 1) // tile_n)
    if num_chunks is None:
        num_chunks = default_chunks                   # = TensorCore count
    num_chunks = max(1, min(int(num_chunks), num_tiles))
    tiles_per_chunk = (num_tiles + num_chunks - 1) // num_chunks
    n_pad = num_chunks * tiles_per_chunk * tile_n
    if n_pad != N:
        x = jnp.pad(x, ((0, n_pad - N), (0, 0)))

    # ---- VMEM budget: double-buffered x tile + weights + temporaries + accumulator.
    x_itemsize = jnp.dtype(x.dtype).itemsize
    est = (2 * tile_n * lane_d * x_itemsize          # x tile, double-buffered
           + 2 * (2 * D * Kp + Kp) * 4               # weights + cpi, double-buffered
           + 4 * tile_n * Kp * 4                     # z / exp / select temporaries
           + tile_n * 128 * 4                        # (tile_n, 1) accumulator (lane pad)
           + 2 * 8 * 128 * 4)                        # output block
    vmem_limit = int(min(vmem_cap, max(32 * 1024 * 1024, 2 * est)))

    kernel = functools.partial(_mog_nll_kernel, n_valid=N, tile_n=tile_n,
                               tiles_per_chunk=tiles_per_chunk)

    partials = pl.pallas_call(
        kernel,
        out_shape=jax.ShapeDtypeStruct((num_chunks, 8, 128), jnp.float32),
        grid_spec=pltpu.PrefetchScalarGridSpec(
            num_scalar_prefetch=0,
            grid=(num_chunks, tiles_per_chunk),
            in_specs=[
                pl.BlockSpec((tile_n, D), lambda c, t: (c * tiles_per_chunk + t, 0)),
                pl.BlockSpec((D, Kp), lambda c, t: (0, 0)),     # -a^T       (full)
                pl.BlockSpec((D, Kp), lambda c, t: (0, 0)),     # (2 a mu)^T (full)
                pl.BlockSpec((1, Kp), lambda c, t: (0, 0)),     # log_pi + c (full)
            ],
            out_specs=pl.BlockSpec((1, 8, 128), lambda c, t: (c, 0, 0)),
            scratch_shapes=[pltpu.VMEM((tile_n, 1), jnp.float32)],
        ),
        compiler_params=pltpu.CompilerParams(
            dimension_semantics=("parallel", "arbitrary"),
            vmem_limit_bytes=vmem_limit,
        ),
    )(x, neg_a, b_mix, cpi_p)

    # Tiny cross-chunk reduction + mean in plain JAX.
    return jnp.sum(partials[:, 0, 0]) / jnp.float32(N)


def mog_nll_ref(x, mu, log_var, w):
    """Plain-JAX reference mirroring the PyTorch forward (reduction='mean')."""
    K = mu.shape[0]
    log_pi = jax.nn.log_softmax(w.reshape(1, K), axis=1)
    diff = x[:, None, :] - mu[None, :, :]
    log_p = (-0.5 * jnp.log(2.0 * jnp.pi)
             - 0.5 * log_var[None, :, :]
             - 0.5 * jnp.exp(-log_var)[None, :, :] * diff * diff)
    log_N = jnp.sum(log_p, axis=2)
    nll = -jax.scipy.special.logsumexp(log_pi + log_N, axis=1)
    return jnp.mean(nll)


if __name__ == "__main__":
    # Small shapes consistent with MoG(D, K): D features, K components, N samples.
    N, D, K = 16, 32, 8

    key = jax.random.PRNGKey(0)
    k_mu, k_x, k_x2 = jax.random.split(key, 3)

    # Deterministic parameter init matching the module's __init__:
    #   mu ~ 0.25 * N(0,1) + 0.5 ; log_var = -3 ; w = 0 (softmax -> uniform pi)
    mu = jax.random.normal(k_mu, (K, D), dtype=jnp.float32) * 0.25 + 0.5
    log_var = jnp.full((K, D), -3.0, dtype=jnp.float32)
    w = jnp.zeros((K,), dtype=jnp.float32)

    # Normalized-style data in [0, 1].
    x = jax.random.uniform(k_x, (N, D), dtype=jnp.float32)

    # Tolerances account for the f32 MXU reformulation (x^2, x matmuls) vs. the
    # reference's direct (x - mu)^2 accumulation order.
    RTOL = ATOL = 3e-4

    out = jax.block_until_ready(mog_nll(x, mu, log_var, w))
    ref = mog_nll_ref(x, mu, log_var, w)
    assert jnp.allclose(out, ref, rtol=RTOL, atol=ATOL), (out, ref)

    # Exercise the masked remainder path (N not a multiple of tile_n) with the
    # auto-sized tile.
    x2 = jax.random.uniform(k_x2, (700, D), dtype=jnp.float32)
    out2 = jax.block_until_ready(mog_nll(x2, mu, log_var, w))
    ref2 = mog_nll_ref(x2, mu, log_var, w)
    assert jnp.allclose(out2, ref2, rtol=RTOL, atol=ATOL), (out2, ref2)

    # Exercise multiple tiles, the parallel chunk axis, an unmasked interior tile,
    # a masked straddling tile and a fully-skipped padded tail tile.
    out3 = jax.block_until_ready(mog_nll(x2, mu, log_var, w, tile_n=256, num_chunks=2))
    assert jnp.allclose(out3, ref2, rtol=RTOL, atol=ATOL), (out3, ref2)

    # TODO(synk): MoG.sample() (multinomial + per-sample Gaussian draws) is not part
    # of the forward pass and is not implemented as a kernel.
    print("KERNEL_OK")
</pallas_src>

<mosaic_0001>
module attributes {stable_mosaic.version = 11 : i64} {
  func.func @_mog_nll_kernel(%arg0: i32, %arg1: i32, %arg2: memref<256x32xf32, #tpu.memory_space<vmem>>, %arg3: memref<32x128xf32, #tpu.memory_space<vmem>>, %arg4: memref<32x128xf32, #tpu.memory_space<vmem>>, %arg5: memref<1x128xf32, #tpu.memory_space<vmem>>, %arg6: memref<1x8x128xf32, #tpu.memory_space<vmem>>, %arg7: memref<256x1xf32, #tpu.memory_space<vmem>>) attributes {dimension_semantics = [#tpu.dimension_semantics<parallel>, #tpu.dimension_semantics<arbitrary>], iteration_bounds = array<i64: 1, 1>, scalar_prefetch = 0 : i64, scratch_operands = 1 : i64, tpu.core_type = #tpu.core_type<tc>, window_params = [{transform_indices = @transform_0, window_bounds = array<i64: 256, 32>}, {pipeline_mode = #tpu.pipeline_mode<synchronous>, transform_indices = @transform_1, window_bounds = array<i64: 32, 128>}, {pipeline_mode = #tpu.pipeline_mode<synchronous>, transform_indices = @transform_2, window_bounds = array<i64: 32, 128>}, {pipeline_mode = #tpu.pipeline_mode<synchronous>, transform_indices = @transform_3, window_bounds = array<i64: 1, 128>}, {transform_indices = @transform_4, window_bounds = array<i64: 1, 8, 128>}]} {
    %c0_i32 = arith.constant 0 : i32
    %0 = arith.cmpi eq, %arg1, %c0_i32 : i32
    %1 = arith.extui %0 : i1 to i32
    %c0_i32_0 = arith.constant 0 : i32
    %2 = arith.cmpi ne, %1, %c0_i32_0 : i32
    scf.if %2 {
      %cst = arith.constant 0.000000e+00 : f32
      %12 = vector.broadcast %cst : f32 to vector<256x1xf32>
      %c0 = arith.constant 0 : index
      %c0_4 = arith.constant 0 : index
      %13 = vector.load %arg7[%c0, %c0_4] : memref<256x1xf32, #tpu.memory_space<vmem>>, vector<256x1xf32>
      tpu.vector_store %arg7[%c0, %c0_4], %12 {strides = array<i32>} : memref<256x1xf32, #tpu.memory_space<vmem>>, vector<256x1xf32>,
    } else {
    }
    %c1_i32 = arith.constant 1 : i32
    %3 = arith.muli %arg0, %c1_i32 : i32
    %4 = arith.addi %3, %arg1 : i32
    %c256_i32 = arith.constant 256 : i32
    %5 = arith.muli %4, %c256_i32 : i32
    %c16_i32 = arith.constant 16 : i32
    %6 = arith.cmpi slt, %5, %c16_i32 : i32
    %7 = arith.extui %6 : i1 to i32
    %c0_i32_1 = arith.constant 0 : i32
    %8 = arith.cmpi ne, %7, %c0_i32_1 : i32
    scf.if %8 {
      %c0 = arith.constant 0 : index
      %c0_4 = arith.constant 0 : index
      %12 = vector.load %arg2[%c0, %c0_4] : memref<256x32xf32, #tpu.memory_space<vmem>>, vector<256x32xf32>
      %c0_5 = arith.constant 0 : index
      %c0_6 = arith.constant 0 : index
      %13 = vector.load %arg5[%c0_5, %c0_6] : memref<1x128xf32, #tpu.memory_space<vmem>>, vector<1x128xf32>
      %14 = arith.mulf %12, %12 : vector<256x32xf32>
      %c0_7 = arith.constant 0 : index
      %c0_8 = arith.constant 0 : index
      %15 = vector.load %arg3[%c0_7, %c0_8] : memref<32x128xf32, #tpu.memory_space<vmem>>, vector<32x128xf32>
      %cst = arith.constant dense<0.000000e+00> : vector<256x128xf32>
      %16 = tpu.matmul %14, %15, %cst {dimension_numbers = #tpu.dot_dimension_numbers<[1], [0], [0], [1], [0, 0, 1, 1], [], []>} : vector<256x32xf32>, vector<32x128xf32>, vector<256x128xf32> -> vector<256x128xf32>
      %17 = vector.broadcast %13 : vector<1x128xf32> to vector<256x128xf32>
      %18 = arith.addf %17, %16 : vector<256x128xf32>
      %c0_9 = arith.constant 0 : index
      %c0_10 = arith.constant 0 : index
      %19 = vector.load %arg4[%c0_9, %c0_10] : memref<32x128xf32, #tpu.memory_space<vmem>>, vector<32x128xf32>
      %cst_11 = arith.constant dense<0.000000e+00> : vector<256x128xf32>
      %20 = tpu.matmul %12, %19, %cst_11 {dimension_numbers = #tpu.dot_dimension_numbers<[1], [0], [0], [1], [0, 0, 1, 1], [], []>} : vector<256x32xf32>, vector<32x128xf32>, vector<256x128xf32> -> vector<256x128xf32>
      %21 = arith.addf %18, %20 : vector<256x128xf32>
      %cst_12 = arith.constant dense<0xFF800000> : vector<256xf32>
      %22 = vector.multi_reduction <maximumf>, %21, %cst_12 [1] : vector<256x128xf32> to vector<256xf32>
      %23 = vector.shape_cast %22 : vector<256xf32> to vector<256x1xf32>
      %24 = vector.broadcast %23 : vector<256x1xf32> to vector<256x128xf32>
      %25 = arith.subf %21, %24 : vector<256x128xf32>
      %26 = math.exp %25 : vector<256x128xf32>
      %cst_13 = arith.constant dense<0.000000e+00> : vector<256xf32>
      %27 = vector.multi_reduction <add>, %26, %cst_13 [1] : vector<256x128xf32> to vector<256xf32>
      %28 = vector.shape_cast %27 : vector<256xf32> to vector<256x1xf32>
      %29 = math.log %28 : vector<256x1xf32>
      %30 = arith.addf %23, %29 : vector<256x1xf32>
      %cst_14 = arith.constant 0.000000e+00 : f32
      %31 = vector.broadcast %cst_14 : f32 to vector<256x1xf32>
      %32 = arith.subf %31, %30 : vector<256x1xf32>
      %c256_i32_15 = arith.constant 256 : i32
      %33 = arith.addi %5, %c256_i32_15 : i32
      %c16_i32_16 = arith.constant 16 : i32
      %34 = arith.cmpi sgt, %33, %c16_i32_16 : i32
      %35 = arith.extui %34 : i1 to i32
      %c0_i32_17 = arith.constant 0 : i32
      %36 = arith.cmpi ne, %35, %c0_i32_17 : i32
      scf.if %36 {
        %41 = tpu.iota {dimensions = array<i32: 0>} : vector<256x1xi32>
        %42 = vector.broadcast %5 : i32 to vector<256x1xi32>
        %43 = arith.addi %42, %41 : vector<256x1xi32>
        %c0_21 = arith.constant 0 : index
        %c0_22 = arith.constant 0 : index
        %44 = vector.load %arg7[%c0_21, %c0_22] : memref<256x1xf32, #tpu.memory_space<vmem>>, vector<256x1xf32>
        %c16_i32_23 = arith.constant 16 : i32
        %45 = vector.broadcast %c16_i32_23 : i32 to vector<256x1xi32>
        %46 = arith.cmpi slt, %43, %45 : vector<256x1xi32>
        %cst_24 = arith.constant 0.000000e+00 : f32
        %47 = vector.broadcast %cst_24 : f32 to vector<256x1xf32>
        %48 = arith.select %46, %32, %47 : vector<256x1xi1>, vector<256x1xf32>
        %49 = arith.addf %44, %48 : vector<256x1xf32>
        %c0_25 = arith.constant 0 : index
        %c0_26 = arith.constant 0 : index
        %50 = vector.load %arg7[%c0_25, %c0_26] : memref<256x1xf32, #tpu.memory_space<vmem>>, vector<256x1xf32>
        tpu.vector_store %arg7[%c0_25, %c0_26], %49 {strides = array<i32>} : memref<256x1xf32, #tpu.memory_space<vmem>>, vector<256x1xf32>,
      } else {
      }
      %c256_i32_18 = arith.constant 256 : i32
      %37 = arith.addi %5, %c256_i32_18 : i32
      %c16_i32_19 = arith.constant 16 : i32
      %38 = arith.cmpi sle, %37, %c16_i32_19 : i32
      %39 = arith.extui %38 : i1 to i32
      %c0_i32_20 = arith.constant 0 : i32
      %40 = arith.cmpi ne, %39, %c0_i32_20 : i32
      scf.if %40 {
        %c0_21 = arith.constant 0 : index
        %c0_22 = arith.constant 0 : index
        %41 = vector.load %arg7[%c0_21, %c0_22] : memref<256x1xf32, #tpu.memory_space<vmem>>, vector<256x1xf32>
        %42 = arith.addf %41, %32 : vector<256x1xf32>
        %c0_23 = arith.constant 0 : index
        %c0_24 = arith.constant 0 : index
        %43 = vector.load %arg7[%c0_23, %c0_24] : memref<256x1xf32, #tpu.memory_space<vmem>>, vector<256x1xf32>
        tpu.vector_store %arg7[%c0_23, %c0_24], %42 {strides = array<i32>} : memref<256x1xf32, #tpu.memory_space<vmem>>, vector<256x1xf32>,
      } else {
      }
    } else {
    }
    %c0_i32_2 = arith.constant 0 : i32
    %9 = arith.cmpi eq, %arg1, %c0_i32_2 : i32
    %10 = arith.extui %9 : i1 to i32
    %c0_i32_3 = arith.constant 0 : i32
    %11 = arith.cmpi ne, %10, %c0_i32_3 : i32
    scf.if %11 {
      %c0 = arith.constant 0 : index
      %c0_4 = arith.constant 0 : index
      %12 = vector.load %arg7[%c0, %c0_4] : memref<256x1xf32, #tpu.memory_space<vmem>>, vector<256x1xf32>
      %13 = vector.shape_cast %12 : vector<256x1xf32> to vector<1x256x1xf32>
      %cst = arith.constant dense<0.000000e+00> : vector<1xf32>
      %14 = vector.multi_reduction <add>, %13, %cst [1, 2] : vector<1x256x1xf32> to vector<1xf32>
      %15 = vector.shape_cast %14 : vector<1xf32> to vector<1x1x1xf32>
      %16 = vector.extract %15[0, 0, 0] : f32 from vector<1x1x1xf32>
      %17 = vector.broadcast %16 : f32 to vector<1x1x1xf32>
      %18 = vector.shape_cast %17 : vector<1x1x1xf32> to vector<1x1x1xf32>
      %19 = vector.broadcast %18 : vector<1x1x1xf32> to vector<1x8x128xf32>
      %c0_5 = arith.constant 0 : index
      %c0_6 = arith.constant 0 : index
      %c0_7 = arith.constant 0 : index
      %20 = vector.load %arg6[%c0_5, %c0_6, %c0_7] : memref<1x8x128xf32, #tpu.memory_space<vmem>>, vector<1x8x128xf32>
      tpu.vector_store %arg6[%c0_5, %c0_6, %c0_7], %19 {strides = array<i32>} : memref<1x8x128xf32, #tpu.memory_space<vmem>>, vector<1x8x128xf32>,
    } else {
    }
    return
  }
  func.func @transform_0(%arg0: i32, %arg1: i32) -> (i32, i32) {
    %c1_i32 = arith.constant 1 : i32
    %0 = arith.muli %arg0, %c1_i32 : i32
    %1 = arith.addi %0, %arg1 : i32
    %c0_i32 = arith.constant 0 : i32
    %c0_i32_0 = arith.constant 0 : i32
    return %1, %c0_i32 : i32, i32
  }
  func.func @transform_1(%arg0: i32, %arg1: i32) -> (i32, i32) {
    %c0_i32 = arith.constant 0 : i32
    %c0_i32_0 = arith.constant 0 : i32
    %c0_i32_1 = arith.constant 0 : i32
    return %c0_i32, %c0_i32_0 : i32, i32
  }
  func.func @transform_2(%arg0: i32, %arg1: i32) -> (i32, i32) {
    %c0_i32 = arith.constant 0 : i32
    %c0_i32_0 = arith.constant 0 : i32
    %c0_i32_1 = arith.constant 0 : i32
    return %c0_i32, %c0_i32_0 : i32, i32
  }
  func.func @transform_3(%arg0: i32, %arg1: i32) -> (i32, i32) {
    %c0_i32 = arith.constant 0 : i32
    %c0_i32_0 = arith.constant 0 : i32
    %c0_i32_1 = arith.constant 0 : i32
    return %c0_i32, %c0_i32_0 : i32, i32
  }
  func.func @transform_4(%arg0: i32, %arg1: i32) -> (i32, i32, i32) {
    %c0_i32 = arith.constant 0 : i32
    %c0_i32_0 = arith.constant 0 : i32
    %c0_i32_1 = arith.constant 0 : i32
    return %arg0, %c0_i32, %c0_i32_0 : i32, i32, i32
  }
}

</mosaic_0001>

<bundles_post_ra>
// kernel: tpu_custom_call.1
= control target key start
LH: loop header
LB: loop body
LE: loop exit
PB: predicated region body
PF: predicated region fallthrough
CT: control target
= control target key end

     0   :  { %vm152_vm0 = vcmask 261120   ;;  %s2319_s0 = inlined_call_operand.vmem [shape: f32[256,32], index: 0, kind: input, shape index: {}]   ;;  %s2320_s1 = inlined_call_operand.vmem [shape: f32[32,128], index: 1, kind: input, shape index: {}]   ;;  %s2321_s2 = inlined_call_operand.vmem [shape: f32[32,128], index: 2, kind: input, shape index: {}]   ;;  %s2322_s3 = inlined_call_operand.vmem [shape: f32[1,128], index: 3, kind: input, shape index: {}]   ;;  %s2323_s4 = inlined_call_operand.hbm [shape: f32[1,8,128], index: 4, kind: output, shape index: {}]  }
   0x1   :  { %v148_v0 = vld [vmem:[%s2320_s1] sm:$0xff]  ;;  %v149_v1 = vld [vmem:[%s2320_s1 + $0x8] sm:$0xff]  ;;  %v150_v5 = vld [vmem:[%s2320_s1 + $0x10] sm:$0xff] }
   0x2   :  { %v512_v2 = vld [vmem:[%s2321_s2] sm:$0xff]  ;;  %v1933_v3 = vpack.c.bf16 %v149_v1, %v148_v0  ;;  %v513_v4 = vld [vmem:[%s2321_s2 + $0x8] sm:$0xff]  ;;  %v151_v6 = vld [vmem:[%s2320_s1 + $0x18] sm:$0xff] }
   0x3   :  { %v1941_v7 = vpack.c.bf16 %v513_v4, %v512_v2  ;;  %v1937_v8 = vpack.c.bf16 %v151_v6, %v150_v5  ;;  %v514_v9 = vld [vmem:[%s2321_s2 + $0x10] sm:$0xff]  ;;  %v515_v10 = vld [vmem:[%s2321_s2 + $0x18] sm:$0xff]  ;;  %v83_v11 = vld [vmem:[%s2319_s0] sm:$0xff] }
   0x4   :  { %1934 = vmatprep.subr.bf16.mxu1 %v1933_v3  ;;  %v1945_v12 = vpack.c.bf16 %v515_v10, %v514_v9  ;;  %v116_v13 = vmul.f32 %v83_v11, %v83_v11  ;;  %1885 = vmatprep.mubr.msk.f32.mxu0 %vm152_vm0, %v83_v11 }
   0x5   :  { %9 = vsyncpa [#allocation4], 0  ;;  %1936 = vmatpush3.bf16.msra.mxu1 %v1933_v3  ;;  %1942 = vmatprep.subr.bf16.mxu0 %v1941_v7  ;;  %v84_v14 = vld [vmem:[%s2319_s0 + $0x8] sm:$0xff]  ;;  %v1716_v16 = vld [vmem:[%s2322_s3] ss:$0 sm:$0xff]  ;;  %vm44_vm1 = vcmask 7168  }
   0x6   :  { %1944 = vmatpush3.bf16.msra.mxu0 %v1941_v7  ;;  %1938 = vmatprep.subr.bf16.mxu1 %v1937_v8  ;;  %v117_v15 = vmul.f32 %v84_v14, %v84_v14  ;;  %v1989_v33 = vmov 0.0   ;;  %v85_v37 = vld [vmem:[%s2319_s0 + $0x10] sm:$0xff]  ;;  %v86_v39 = vld [vmem:[%s2319_s0 + $0x18] sm:$0xff]  ;;  %v87_v42 = vld [vmem:[%s2319_s0 + $0x20] sm:$0xff] }
   0x7   :  { %1946 = vmatprep.subr.bf16.mxu0 %v1945_v12  ;;  %1829 = vmatprep.mubr.msk.f32.mxu1 %vm152_vm0, %v116_v13  ;;  %45 = vst.msk [vmem:[#allocation2] sm:$0xff] %vm44_vm1, %v1989_v33  ;;  %46 = vst.msk [vmem:[#allocation2 + $0x8] sm:$0xff] %vm44_vm1, %v1989_v33  ;;  %v118_v38 = vmul.f32 %v85_v37, %v85_v37  ;;  %v119_v40 = vmul.f32 %v86_v39, %v86_v39  ;;  %v88_v44 = vld [vmem:[%s2319_s0 + $0x28] sm:$0xff]  ;;  %v89_v48 = vld [vmem:[%s2319_s0 + $0x30] sm:$0xff] }
   0x8   :  { %47 = vst.msk [vmem:[#allocation2 + $0x10] sm:$0xff] %vm44_vm1, %v1989_v33  ;;  %48 = vst.msk [vmem:[#allocation2 + $0x18] sm:$0xff] %vm44_vm1, %v1989_v33  ;;  %v120_v43 = vmul.f32 %v87_v42, %v87_v42  ;;  %v121_v46 = vmul.f32 %v88_v44, %v88_v44  ;;  %v122_v49 = vmul.f32 %v89_v48, %v89_v48  ;;  %v90_v50 = vld [vmem:[%s2319_s0 + $0x38] sm:$0xff]  ;;  %v91_v53 = vld [vmem:[%s2319_s0 + $0x40] sm:$0xff] }
   0x9   :  { %1940 = vmatpush3.bf16.msra.mxu1 %v1937_v8  ;;  %49 = vst.msk [vmem:[#allocation2 + $0x20] sm:$0xff] %vm44_vm1, %v1989_v33  ;;  %50 = vst.msk [vmem:[#allocation2 + $0x28] sm:$0xff] %vm44_vm1, %v1989_v33  ;;  %v123_v52 = vmul.f32 %v90_v50, %v90_v50  ;;  %v92_v54 = vld [vmem:[%s2319_s0 + $0x48] sm:$0xff]  ;;  %v93_v55 = vld [vmem:[%s2319_s0 + $0x50] sm:$0xff]  ;;  %v124_v56 = vmul.f32 %v91_v53, %v91_v53 }
   0xa   :  { %1948 = vmatpush3.bf16.msra.mxu0 %v1945_v12  ;;  %51 = vst.msk [vmem:[#allocation2 + $0x30] sm:$0xff] %vm44_vm1, %v1989_v33  ;;  %52 = vst.msk [vmem:[#allocation2 + $0x38] sm:$0xff] %vm44_vm1, %v1989_v33  ;;  %v125_v57 = vmul.f32 %v92_v54, %v92_v54  ;;  %v126_v58 = vmul.f32 %v93_v55, %v93_v55  ;;  %v94_v59 = vld [vmem:[%s2319_s0 + $0x58] sm:$0xff]  ;;  %v95_v60 = vld [vmem:[%s2319_s0 + $0x60] sm:$0xff] }
   0xb   :  { %53 = vst.msk [vmem:[#allocation2 + $0x40] sm:$0xff] %vm44_vm1, %v1989_v33  ;;  %54 = vst.msk [vmem:[#allocation2 + $0x48] sm:$0xff] %vm44_vm1, %v1989_v33  ;;  %v127_v61 = vmul.f32 %v94_v59, %v94_v59  ;;  %v128_v62 = vmul.f32 %v95_v60, %v95_v60  ;;  %v96_v63 = vld [vmem:[%s2319_s0 + $0x68] sm:$0xff]  ;;  %v97_v0 = vld [vmem:[%s2319_s0 + $0x70] sm:$0xff] }
   0xc   :  { %1830 = vmatmul.mubr.msk.f32.vlgmr.msra.gmra.mrb[0].mxu1 %vm152_vm0, %v117_v15  ;;  %55 = vst.msk [vmem:[#allocation2 + $0x50] sm:$0xff] %vm44_vm1, %v1989_v33  ;;  %56 = vst.msk [vmem:[#allocation2 + $0x58] sm:$0xff] %vm44_vm1, %v1989_v33  ;;  %v98_v1 = vld [vmem:[%s2319_s0 + $0x78] sm:$0xff]  ;;  %v129_v5 = vmul.f32 %v96_v63, %v96_v63  ;;  %v99_v6 = vld [vmem:[%s2319_s0 + $0x80] sm:$0xff]  ;;  %v130_v10 = vmul.f32 %v97_v0, %v97_v0 }
   0xd   :  { %1886 = vmatmul.mubr.msk.f32.vlgmr.msra.gmra.mrb[0].mxu0 %vm152_vm0, %v84_v14  ;;  %57 = vst.msk [vmem:[#allocation2 + $0x60] sm:$0xff] %vm44_vm1, %v1989_v33  ;;  %58 = vst.msk [vmem:[#allocation2 + $0x68] sm:$0xff] %vm44_vm1, %v1989_v33  ;;  %1832 = vmatprep.mubr.msk.f32.mxu1 %vm152_vm0, %v118_v38 }
   0xe   :  { %59 = vst.msk [vmem:[#allocation2 + $0x70] sm:$0xff] %vm44_vm1, %v1989_v33  ;;  %60 = vst.msk [vmem:[#allocation2 + $0x78] sm:$0xff] %vm44_vm1, %v1989_v33  ;;  %1888 = vmatprep.mubr.msk.f32.mxu0 %vm152_vm0, %v85_v37  ;;  %v103_v37 = vld [vmem:[%s2319_s0 + $0xa0] sm:$0xff] }
   0xf   :  { %61 = vst.msk [vmem:[#allocation2 + $0x80] sm:$0xff] %vm44_vm1, %v1989_v33  ;;  %62 = vst.msk [vmem:[#allocation2 + $0x88] sm:$0xff] %vm44_vm1, %v1989_v33  ;;  %v1294_v34 = vld [vmem:[#allocation2 + $0x10] sm:$0xff]  ;;  %v1295_v35 = vld [vmem:[#allocation2 + $0x18] sm:$0xff] }
  0x10   :  { %63 = vst.msk [vmem:[#allocation2 + $0x90] sm:$0xff] %vm44_vm1, %v1989_v33  ;;  %64 = vst.msk [vmem:[#allocation2 + $0x98] sm:$0xff] %vm44_vm1, %v1989_v33  ;;  %v1296_v36 = vld [vmem:[#allocation2 + $0x20] sm:$0xff]  ;;  %v1297_v41 = vld [vmem:[#allocation2 + $0x28] sm:$0xff]  ;;  %1833 = vmatmul.mubr.msk.f32.gmra.mrb[2].mxu1 %vm152_vm0, %v119_v40 }
  0x11   :  { %65 = vst.msk [vmem:[#allocation2 + $0xa0] sm:$0xff] %vm44_vm1, %v1989_v33  ;;  %66 = vst.msk [vmem:[#allocation2 + $0xa8] sm:$0xff] %vm44_vm1, %v1989_v33  ;;  %1889 = vmatmul.mubr.msk.f32.gmra.mrb[2].mxu0 %vm152_vm0, %v86_v39  ;;  %v1298_v45 = vld [vmem:[#allocation2 + $0x30] sm:$0xff]  ;;  %1835 = vmatprep.mubr.msk.f32.mxu1 %vm152_vm0, %v120_v43  ;;  %v1299_v47 = vld [vmem:[#allocation2 + $0x38] sm:$0xff]  ;;  %v136_v39 = vmul.f32 %v103_v37, %v103_v37 }
  0x12   :  { %67 = vst.msk [vmem:[#allocation2 + $0xb0] sm:$0xff] %vm44_vm1, %v1989_v33  ;;  %68 = vst.msk [vmem:[#allocation2 + $0xb8] sm:$0xff] %vm44_vm1, %v1989_v33  ;;  %1891 = vmatprep.mubr.msk.f32.mxu0 %vm152_vm0, %v87_v42  ;;  %v1300_v51 = vld [vmem:[#allocation2 + $0x40] sm:$0xff]  ;;  %v1301_v2 = vld [vmem:[#allocation2 + $0x48] sm:$0xff] }
  0x13   :  { %69 = vst.msk [vmem:[#allocation2 + $0xc0] sm:$0xff] %vm44_vm1, %v1989_v33  ;;  %70 = vst.msk [vmem:[#allocation2 + $0xc8] sm:$0xff] %vm44_vm1, %v1989_v33  ;;  %v1302_v3 = vld [vmem:[#allocation2 + $0x50] sm:$0xff]  ;;  %v1303_v4 = vld [vmem:[#allocation2 + $0x58] sm:$0xff] }
  0x14   :  { %71 = vst.msk [vmem:[#allocation2 + $0xd0] sm:$0xff] %vm44_vm1, %v1989_v33  ;;  %72 = vst.msk [vmem:[#allocation2 + $0xd8] sm:$0xff] %vm44_vm1, %v1989_v33  ;;  %1836 = vmatmul.mubr.msk.f32.gmra.mrb[4].mxu1 %vm152_vm0, %v121_v46  ;;  %v1304_v7 = vld [vmem:[#allocation2 + $0x60] sm:$0xff]  ;;  %v1305_v8 = vld [vmem:[#allocation2 + $0x68] sm:$0xff] }
  0x15   :  { %73 = vst.msk [vmem:[#allocation2 + $0xe0] sm:$0xff] %vm44_vm1, %v1989_v33  ;;  %74 = vst.msk [vmem:[#allocation2 + $0xe8] sm:$0xff] %vm44_vm1, %v1989_v33  ;;  %1892 = vmatmul.mubr.msk.f32.gmra.mrb[4].mxu0 %vm152_vm0, %v88_v44  ;;  %1838 = vmatprep.mubr.msk.f32.mxu1 %vm152_vm0, %v122_v49  ;;  %v1306_v9 = vld [vmem:[#allocation2 + $0x70] sm:$0xff]  ;;  %v1307_v11 = vld [vmem:[#allocation2 + $0x78] sm:$0xff] }
  0x16   :  { %75 = vst.msk [vmem:[#allocation2 + $0xf0] sm:$0xff] %vm44_vm1, %v1989_v33  ;;  %76 = vst.msk [vmem:[#allocation2 + $0xf8] sm:$0xff] %vm44_vm1, %v1989_v33  ;;  %1894 = vmatprep.mubr.msk.f32.mxu0 %vm152_vm0, %v89_v48  ;;  %v1308_v12 = vld [vmem:[#allocation2 + $0x80] sm:$0xff]  ;;  %v1309_v13 = vld [vmem:[#allocation2 + $0x88] sm:$0xff] }
  0x17   :  { %1423 = vst.msk [vmem:[#allocation2 + $0x10] sm:$0xff] %vm44_vm1, %v1294_v34  ;;  %1424 = vst.msk [vmem:[#allocation2 + $0x18] sm:$0xff] %vm44_vm1, %v1295_v35  ;;  %v1310_v14 = vld [vmem:[#allocation2 + $0x90] sm:$0xff]  ;;  %v1311_v15 = vld [vmem:[#allocation2 + $0x98] sm:$0xff] }
  0x18   :  { %1425 = vst.msk [vmem:[#allocation2 + $0x20] sm:$0xff] %vm44_vm1, %v1296_v36  ;;  %1426 = vst.msk [vmem:[#allocation2 + $0x28] sm:$0xff] %vm44_vm1, %v1297_v41  ;;  %1839 = vmatmul.mubr.msk.f32.gmra.mrb[6].mxu1 %vm152_vm0, %v123_v52  ;;  %v102_v36 = vld [vmem:[%s2319_s0 + $0x98] sm:$0xff]  ;;  %v104_v40 = vld [vmem:[%s2319_s0 + $0xa8] sm:$0xff] }
  0x19   :  { %1427 = vst.msk [vmem:[#allocation2 + $0x30] sm:$0xff] %vm44_vm1, %v1298_v45  ;;  %1428 = vst.msk [vmem:[#allocation2 + $0x38] sm:$0xff] %vm44_vm1, %v1299_v47  ;;  %1895 = vmatmul.mubr.msk.f32.gmra.mrb[6].mxu0 %vm152_vm0, %v90_v50  ;;  %1841 = vmatprep.mubr.msk.f32.mxu1 %vm152_vm0, %v124_v56  ;;  %v135_v38 = vmul.f32 %v102_v36, %v102_v36  ;;  %v105_v41 = vld [vmem:[%s2319_s0 + $0xb0] sm:$0xff]  ;;  %v137_v42 = vmul.f32 %v104_v40, %v104_v40  ;;  %v106_v44 = vld [vmem:[%s2319_s0 + $0xb8] sm:$0xff] }
  0x1a   :  { %1429 = vst.msk [vmem:[#allocation2 + $0x40] sm:$0xff] %vm44_vm1, %v1300_v51  ;;  %1897 = vmatprep.mubr.msk.f32.mxu0 %vm152_vm0, %v91_v53  ;;  %1430 = vst.msk [vmem:[#allocation2 + $0x48] sm:$0xff] %vm44_vm1, %v1301_v2  ;;  %v138_v43 = vmul.f32 %v105_v41, %v105_v41  ;;  %v107_v45 = vld [vmem:[%s2319_s0 + $0xc0] sm:$0xff]  ;;  %v139_v46 = vmul.f32 %v106_v44, %v106_v44  ;;  %v108_v48 = vld [vmem:[%s2319_s0 + $0xc8] sm:$0xff] }
  0x1b   :  { %1431 = vst.msk [vmem:[#allocation2 + $0x50] sm:$0xff] %vm44_vm1, %v1302_v3  ;;  %1432 = vst.msk [vmem:[#allocation2 + $0x58] sm:$0xff] %vm44_vm1, %v1303_v4  ;;  %v140_v47 = vmul.f32 %v107_v45, %v107_v45  ;;  %v109_v49 = vld [vmem:[%s2319_s0 + $0xd0] sm:$0xff]  ;;  %v141_v50 = vmul.f32 %v108_v48, %v108_v48  ;;  %v110_v52 = vld [vmem:[%s2319_s0 + $0xd8] sm:$0xff] }
  0x1c   :  { %1842 = vmatmul.mubr.msk.f32.gmra.mrb[8].mxu1 %vm152_vm0, %v125_v57  ;;  %1433 = vst.msk [vmem:[#allocation2 + $0x60] sm:$0xff] %vm44_vm1, %v1304_v7  ;;  %1434 = vst.msk [vmem:[#allocation2 + $0x68] sm:$0xff] %vm44_vm1, %v1305_v8  ;;  %v142_v51 = vmul.f32 %v109_v49, %v109_v49  ;;  %v111_v53 = vld [vmem:[%s2319_s0 + $0xe0] sm:$0xff]  ;;  %v112_v56 = vld [vmem:[%s2319_s0 + $0xe8] sm:$0xff] }
  0x1d   :  { %1898 = vmatmul.mubr.msk.f32.gmra.mrb[8].mxu0 %vm152_vm0, %v92_v54  ;;  %1844 = vmatprep.mubr.msk.f32.mxu1 %vm152_vm0, %v126_v58  ;;  %1435 = vst.msk [vmem:[#allocation2 + $0x70] sm:$0xff] %vm44_vm1, %v1306_v9  ;;  %1436 = vst.msk [vmem:[#allocation2 + $0x78] sm:$0xff] %vm44_vm1, %v1307_v11  ;;  %v1323_v33 = vld [vmem:[#allocation2 + $0xf8] sm:$0xff]  ;;  %v143_v54 = vmul.f32 %v110_v52, %v110_v52  ;;  %v113_v57 = vld [vmem:[%s2319_s0 + $0xf0] sm:$0xff]  ;;  %v145_v58 = vmul.f32 %v112_v56, %v112_v56 }
  0x1e   :  { %1900 = vmatprep.mubr.msk.f32.mxu0 %vm152_vm0, %v93_v55  ;;  %1437 = vst.msk [vmem:[#allocation2 + $0x80] sm:$0xff] %vm44_vm1, %v1308_v12  ;;  %1438 = vst.msk [vmem:[#allocation2 + $0x88] sm:$0xff] %vm44_vm1, %v1309_v13  ;;  %v144_v55 = vmul.f32 %v111_v53, %v111_v53  ;;  %v1292_v4 = vld [vmem:[#allocation2] sm:$0xff]  ;;  %v1293_v9 = vld [vmem:[#allocation2 + $0x8] sm:$0xff] }
  0x1f   :  { %1439 = vst.msk [vmem:[#allocation2 + $0x90] sm:$0xff] %vm44_vm1, %v1310_v14  ;;  %1440 = vst.msk [vmem:[#allocation2 + $0x98] sm:$0xff] %vm44_vm1, %v1311_v15  ;;  %v1559_v13 = vld [vmem:[#allocation2 + $0x10] sm:$0xff]  ;;  %v1560_v15 = vld [vmem:[#allocation2 + $0x18] sm:$0xff] }
  0x20   :  { %1845 = vmatmul.mubr.msk.f32.gmra.mrb[10].mxu1 %vm152_vm0, %v127_v61  ;;  %1452 = vst.msk [vmem:[#allocation2 + $0xf8] sm:$0xff] %vm44_vm1, %v1323_v33 }
  0x21   :  { %1901 = vmatmul.mubr.msk.f32.gmra.mrb[10].mxu0 %vm152_vm0, %v94_v59  ;;  %1847 = vmatprep.mubr.msk.f32.mxu1 %vm152_vm0, %v128_v62  ;;  %v146_v59 = vmul.f32 %v113_v57, %v113_v57 }
  0x22   :  { %1903 = vmatprep.mubr.msk.f32.mxu0 %vm152_vm0, %v95_v60  ;;  %v114_v60 = vld [vmem:[%s2319_s0 + $0xf8] sm:$0xff] }
  0x23   :  { %v147_v61 = vmul.f32 %v114_v60, %v114_v60 }
  0x24   :  { %1848 = vmatmul.mubr.msk.f32.gmra.mrb[12].mxu1 %vm152_vm0, %v129_v5 }
  0x25   :  { %1904 = vmatmul.mubr.msk.f32.gmra.mrb[12].mxu0 %vm152_vm0, %v96_v63  ;;  %1850 = vmatprep.mubr.msk.f32.mxu1 %vm152_vm0, %v130_v10 }
  0x26   :  { %1906 = vmatprep.mubr.msk.f32.mxu0 %vm152_vm0, %v97_v0 }
  0x29   :  { %1907 = vmatmul.mubr.msk.f32.gmra.mrb[14].mxu0 %vm152_vm0, %v98_v1 }
  0x2a   :  { %1909 = vmatprep.mubr.msk.f32.mxu0 %vm152_vm0, %v99_v6 }
  0xdf   :  { %v1831_v17 = vpop.f32.mrb[0].mxu1 }
  0xe0   :  { %v481_v18 = vadd.f32 %v1831_v17, %v1716_v16  ;;  %v315_v19 = vpop.f32.mrb[1].mxu1  ;;  %v1887_v20 = vpop.f32.mrb[0].mxu0  ;;  %v100_v17 = vld [vmem:[%s2319_s0 + $0x88] sm:$0xff] }
  0xe1   :  { %v480_v21 = vadd.f32 %v1716_v16, %v315_v19  ;;  %v678_v22 = vpop.f32.mrb[1].mxu0  ;;  %v1312_v16 = vld [vmem:[#allocation2 + $0xa0] sm:$0xff]  ;;  %v1314_v19 = vld [vmem:[#allocation2 + $0xb0] sm:$0xff]  ;;  %v133_v34 = vmul.f32 %v100_v17, %v100_v17  ;;  %1910 = vmatmul.mubr.msk.f32.gmra.mrb[16].mxu0 %vm152_vm0, %v100_v17  ;;  %v1593_v17 = vsel %vm44_vm1, %v1559_v13, 0.0 }
  0xe2   :  { %v838_v23 = vadd.f32 %v1887_v20, %v481_v18  ;;  %v1313_v18 = vld [vmem:[#allocation2 + $0xa8] sm:$0xff]  ;;  %v1315_v20 = vld [vmem:[#allocation2 + $0xb8] sm:$0xff]  ;;  %1441 = vst.msk [vmem:[#allocation2 + $0xa0] sm:$0xff] %vm44_vm1, %v1312_v16  ;;  %1443 = vst.msk [vmem:[#allocation2 + $0xb0] sm:$0xff] %vm44_vm1, %v1314_v19 }
  0xe3   :  { %v837_v24 = vadd.f32 %v678_v22, %v480_v21  ;;  %v131_v21 = vmul.f32 %v98_v1, %v98_v1  ;;  %v1316_v22 = vld [vmem:[#allocation2 + $0xc0] sm:$0xff]  ;;  %1442 = vst.msk [vmem:[#allocation2 + $0xa8] sm:$0xff] %vm44_vm1, %v1313_v18  ;;  %1444 = vst.msk [vmem:[#allocation2 + $0xb8] sm:$0xff] %vm44_vm1, %v1315_v20 }
  0xe4   :  { %1445 = vst.msk [vmem:[#allocation2 + $0xc0] sm:$0xff] %vm44_vm1, %v1316_v22  ;;  %v1561_v18 = vld [vmem:[#allocation2 + $0x20] sm:$0xff] }
  0xe5   :  { %869 = vmax.xlane.f32.xlu0 %v837_v24  ;;  %1851 = vmatmul.mubr.msk.f32.gmra.mrb[14].mxu1 %vm152_vm0, %v131_v21  ;;  %v1562_v21 = vld [vmem:[#allocation2 + $0x28] sm:$0xff]  ;;  %v1597_v22 = vsel %vm44_vm1, %v1561_v18, 0.0 }
  0xe9   :  { %871 = vmax.xlane.f32.xlu0 %v838_v23 }
 0x172   :  { %v2053_v25 = vpop.xlane.xlu0 %869 }
 0x173   :  { %v933_v26 = vsub.f32 %v837_v24, %v2053_v25  ;;  %v1318_v24 = vld [vmem:[#allocation2 + $0xd0] sm:$0xff] }
 0x174   :  { %1447 = vst.msk [vmem:[#allocation2 + $0xd0] sm:$0xff] %vm44_vm1, %v1318_v24  ;;  %v1563_v24 = vld [vmem:[#allocation2 + $0x30] sm:$0xff] }
 0x175   :  { %v965_v27 = vmul.f32 1.442695, %v933_v26  ;;  %v132_v26 = vmul.f32 %v99_v6, %v99_v6 }
 0x176   :  { %v2056_v28 = vpop.xlane.xlu0 %871 }
 0x177   :  { %v934_v29 = vsub.f32 %v838_v23, %v2056_v28  ;;  %1957 = vpow2.f32 %v965_v27  ;;  %v1317_v23 = vld [vmem:[#allocation2 + $0xc8] sm:$0xff]  ;;  %v1319_v27 = vld [vmem:[#allocation2 + $0xd8] sm:$0xff]  ;;  %1853 = vmatprep.mubr.msk.f32.mxu1 %vm152_vm0, %v132_v26  ;;  %v1599_v26 = vsel %vm44_vm1, %v1562_v21, 0.0 }
 0x178   :  { %1446 = vst.msk [vmem:[#allocation2 + $0xc8] sm:$0xff] %vm44_vm1, %v1317_v23  ;;  %1448 = vst.msk [vmem:[#allocation2 + $0xd8] sm:$0xff] %vm44_vm1, %v1319_v27  ;;  %1854 = vmatmul.mubr.msk.f32.gmra.mrb[16].mxu1 %vm152_vm0, %v133_v34  ;;  %v1566_v34 = vld [vmem:[#allocation2 + $0x48] sm:$0xff] }
 0x179   :  { %v967_v30 = vmul.f32 1.442695, %v934_v29  ;;  %v1320_v29 = vld [vmem:[#allocation2 + $0xe0] sm:$0xff] }
 0x17a   :  { %1449 = vst.msk [vmem:[#allocation2 + $0xe0] sm:$0xff] %vm44_vm1, %v1320_v29  ;;  %v1564_v29 = vld [vmem:[#allocation2 + $0x38] sm:$0xff] }
 0x17b   :  { %1959 = vpow2.f32 %v967_v30  ;;  %v1321_v30 = vld [vmem:[#allocation2 + $0xe8] sm:$0xff]  ;;  %v1603_v33 = vsel %vm44_vm1, %v1564_v29, 0.0 }
 0x17c   :  { %1450 = vst.msk [vmem:[#allocation2 + $0xe8] sm:$0xff] %vm44_vm1, %v1321_v30  ;;  %v1601_v30 = vsel %vm44_vm1, %v1563_v24, 0.0 }
 0x181   :  { %v1958_v31 = vpop.eup %1957 }
 0x182   :  { %1029 = vadd.xlane.f32.xlu1 %v1958_v31  ;;  %v101_v31 = vld [vmem:[%s2319_s0 + $0x90] sm:$0xff]  ;;  %s1990_s0 = smov [#allocation3]  }
 0x183   :  { %v134_v35 = vmul.f32 %v101_v31, %v101_v31  ;;  %1912 = vmatprep.mubr.msk.f32.mxu0 %vm152_vm0, %v101_v31  ;;  %v1565_v31 = vld [vmem:[#allocation2 + $0x40] sm:$0xff]  ;;  %s1670_s10 = sshll.u32 %s1990_s0, 4  ;;  %s1671_s10 = int_to_ptr.vmem [resolvable:$true] %s1670_s10 }
 0x184   :  { %1913 = vmatmul.mubr.msk.f32.gmra.mrb[18].mxu0 %vm152_vm0, %v102_v36  ;;  %v1605_v36 = vsel %vm44_vm1, %v1565_v31, 0.0  ;;  %s1965_s12 = scalar_lea.vmem %s1671_s10, 128  ;;  %p1970_p1 = scmp.lt.s32.totalorder %s1671_s10, %s1671_s10 }
 0x185   :  { %v1960_v32 = vpop.eup %1959  ;;  %1856 = vmatprep.mubr.msk.f32.mxu1 %vm152_vm0, %v134_v35  ;;  %1915 = vmatprep.mubr.msk.f32.mxu0 %vm152_vm0, %v103_v37  ;;  %v1567_v37 = vld [vmem:[#allocation2 + $0x50] sm:$0xff]  ;;  %p1966_p0 = scmp.ne.s32.totalorder %s1671_s10, %s1965_s12  ;;  %p1971_p2 = scmp.lt.s32.totalorder %s1965_s12, %s1965_s12 }
 0x186   :  { %1031 = vadd.xlane.f32.xlu1 %v1960_v32  ;;  %v1322_v32 = vld [vmem:[#allocation2 + $0xf0] sm:$0xff]  ;;  %1857 = vmatmul.mubr.msk.f32.gmra.mrb[18].mxu1 %vm152_vm0, %v135_v38 }
 0x187   :  { %1451 = vst.msk [vmem:[#allocation2 + $0xf0] sm:$0xff] %vm44_vm1, %v1322_v32  ;;  %1859 = vmatprep.mubr.msk.f32.mxu1 %vm152_vm0, %v136_v39  ;;  %v1607_v39 = vsel %vm44_vm1, %v1566_v34, 0.0  ;;  %p1972_p3 = por %p1971_p2, %p1970_p1 }
 0x188   :  { %1916 = vmatmul.mubr.msk.f32.gmra.mrb[20].mxu0 %vm152_vm0, %v104_v40  ;;  %v1568_v40 = vld [vmem:[#allocation2 + $0x58] sm:$0xff] }
 0x189   :  { %1918 = vmatprep.mubr.msk.f32.mxu0 %vm152_vm0, %v105_v41  ;;  %p1973_p4 = pnand %p1972_p3, %p1966_p0 }
 0x18a   :  { %1860 = vmatmul.mubr.msk.f32.gmra.mrb[20].mxu1 %vm152_vm0, %v137_v42  ;;  %v1609_v42 = vsel %vm44_vm1, %v1567_v37, 0.0 }
 0x18b   :  { %1862 = vmatprep.mubr.msk.f32.mxu1 %vm152_vm0, %v138_v43  ;;  %v1569_v43 = vld [vmem:[#allocation2 + $0x60] sm:$0xff] }
 0x18c   :  { %1919 = vmatmul.mubr.msk.f32.gmra.mrb[22].mxu0 %vm152_vm0, %v106_v44 }
 0x18d   :  { %1921 = vmatprep.mubr.msk.f32.mxu0 %vm152_vm0, %v107_v45  ;;  %v1611_v45 = vsel %vm44_vm1, %v1568_v40, 0.0 }
 0x18e   :  { %1863 = vmatmul.mubr.msk.f32.gmra.mrb[22].mxu1 %vm152_vm0, %v139_v46  ;;  %v1570_v46 = vld [vmem:[#allocation2 + $0x68] sm:$0xff] }
 0x18f   :  { %1865 = vmatprep.mubr.msk.f32.mxu1 %vm152_vm0, %v140_v47 }
 0x190   :  { %1922 = vmatmul.mubr.msk.f32.gmra.mrb[24].mxu0 %vm152_vm0, %v108_v48  ;;  %v1613_v48 = vsel %vm44_vm1, %v1569_v43, 0.0  ;;  %v1890_v43 = vpop.f32.mrb[2].mxu0 }
 0x191   :  { %1924 = vmatprep.mubr.msk.f32.mxu0 %vm152_vm0, %v109_v49  ;;  %v1571_v49 = vld [vmem:[#allocation2 + $0x70] sm:$0xff] }
 0x192   :  { %1866 = vmatmul.mubr.msk.f32.gmra.mrb[24].mxu1 %vm152_vm0, %v141_v50 }
 0x193   :  { %1868 = vmatprep.mubr.msk.f32.mxu1 %vm152_vm0, %v142_v51  ;;  %v1615_v51 = vsel %vm44_vm1, %v1570_v46, 0.0 }
 0x194   :  { %1925 = vmatmul.mubr.msk.f32.gmra.mrb[26].mxu0 %vm152_vm0, %v110_v52  ;;  %v1572_v52 = vld [vmem:[#allocation2 + $0x78] sm:$0xff] }
 0x195   :  { %1927 = vmatprep.mubr.msk.f32.mxu0 %vm152_vm0, %v111_v53 }
 0x196   :  { %1869 = vmatmul.mubr.msk.f32.gmra.mrb[26].mxu1 %vm152_vm0, %v143_v54  ;;  %v1617_v54 = vsel %vm44_vm1, %v1571_v49, 0.0 }
 0x197   :  { %1871 = vmatprep.mubr.msk.f32.mxu1 %vm152_vm0, %v144_v55  ;;  %v1573_v55 = vld [vmem:[#allocation2 + $0x80] sm:$0xff] }
 0x198   :  { %1928 = vmatmul.mubr.msk.f32.gmra.mrb[28].mxu0 %vm152_vm0, %v112_v56 }
 0x199   :  { %1930 = vmatprep.mubr.msk.f32.mxu0 %vm152_vm0, %v113_v57  ;;  %v1619_v57 = vsel %vm44_vm1, %v1572_v52, 0.0 }
 0x19a   :  { %1872 = vmatmul.mubr.msk.f32.gmra.mrb[28].mxu1 %vm152_vm0, %v145_v58  ;;  %v1574_v58 = vld [vmem:[#allocation2 + $0x88] sm:$0xff] }
 0x19b   :  { %1874 = vmatprep.mubr.msk.f32.mxu1 %vm152_vm0, %v146_v59 }
 0x19c   :  { %1931 = vmatmul.mubr.msk.f32.gmra.mrb[30].mxu0 %vm152_vm0, %v114_v60  ;;  %v1621_v60 = vsel %vm44_vm1, %v1573_v55, 0.0 }
 0x19e   :  { %1875 = vmatmul.mubr.msk.f32.gmra.mrb[30].mxu1 %vm152_vm0, %v147_v61  ;;  %v1575_v61 = vld [vmem:[#allocation2 + $0x90] sm:$0xff] }
 0x20f   :  { %v1030_v62 = vpop.xlane.xlu1 %1029 }
 0x210   :  { %1961 = vlog2.f32 %v1030_v62 }
 0x213   :  { %v1032_v63 = vpop.xlane.xlu1 %1031 }
 0x214   :  { %1963 = vlog2.f32 %v1032_v63  ;;  %v1623_v63 = vsel %vm44_vm1, %v1574_v58, 0.0 }
 0x21a   :  { %v1962_v0 = vpop.eup %1961 }
 0x21b   :  { %v1094_v1 = vmul.f32 0.6931472, %v1962_v0  ;;  %v1576_v0 = vld [vmem:[#allocation2 + $0x98] sm:$0xff] }
 0x21d   :  { %v1157_v2 = vadd.f32 %v1094_v1, %v2053_v25 }
 0x21e   :  { %v1964_v3 = vpop.eup %1963 }
 0x21f   :  { %v1189_v5 = vsub.f32 0.0, %v1157_v2  ;;  %v1096_v6 = vmul.f32 0.6931472, %v1964_v3  ;;  %v1625_v2 = vsel %vm44_vm1, %v1575_v61, 0.0  ;;  %v1577_v3 = vld [vmem:[#allocation2 + $0xa0] sm:$0xff] }
 0x221   :  { %v1388_v7 = vadd.f32 %v1292_v4, %v1189_v5  ;;  %v1158_v8 = vadd.f32 %v1096_v6, %v2056_v28  ;;  %v1595_v28 = vsel %vm44_vm1, %v1560_v15, 0.0  ;;  %v1627_v5 = vsel %vm44_vm1, %v1576_v0, 0.0  ;;  %v1578_v6 = vld [vmem:[#allocation2 + $0xa8] sm:$0xff]  ;;  %v1581_v15 = vld [vmem:[#allocation2 + $0xc0] sm:$0xff] }
 0x223   :  { %1421 = vst.msk [vmem:[#allocation2] sm:$0xff] %vm44_vm1, %v1388_v7  ;;  %v1190_v10 = vsub.f32 0.0, %v1158_v8  ;;  %v1629_v8 = vsel %vm44_vm1, %v1577_v3, 0.0 }
 0x225   :  { %v1389_v11 = vadd.f32 %v1293_v9, %v1190_v10  ;;  %v1579_v9 = vld [vmem:[#allocation2 + $0xb0] sm:$0xff] }
 0x227   :  { %1422 = vst.msk [vmem:[#allocation2 + $0x8] sm:$0xff] %vm44_vm1, %v1389_v11  ;;  %v1631_v11 = vsel %vm44_vm1, %v1578_v6, 0.0 }
 0x22a   :  { %v1557_v12 = vld [vmem:[#allocation2] sm:$0xff] }
 0x22b   :  { %v1590_v25 = vsel %vm44_vm1, %v1557_v12, 0.0  ;;  %v1580_v12 = vld [vmem:[#allocation2 + $0xb8] sm:$0xff] }
 0x22e   :  { %v1558_v14 = vld [vmem:[#allocation2 + $0x8] sm:$0xff] }
 0x22f   :  { %v1591_v16 = vsel %vm44_vm1, %v1558_v14, 0.0  ;;  %v1633_v14 = vsel %vm44_vm1, %v1579_v9, 0.0 }
 0x230   :  { %v1592_v19 = vadd.f32 %v1591_v16, %v1590_v25  ;;  %v1635_v16 = vsel %vm44_vm1, %v1580_v12, 0.0 }
 0x232   :  { %v1594_v20 = vadd.f32 %v1593_v17, %v1592_v19  ;;  %v1582_v17 = vld [vmem:[#allocation2 + $0xc8] sm:$0xff]  ;;  %v1637_v19 = vsel %vm44_vm1, %v1581_v15, 0.0 }
 0x233   :  { %v1639_v21 = vsel %vm44_vm1, %v1582_v17, 0.0 }
 0x234   :  { %v1596_v23 = vadd.f32 %v1595_v28, %v1594_v20  ;;  %v1583_v28 = vld [vmem:[#allocation2 + $0xd0] sm:$0xff] }
 0x235   :  { %v1641_v24 = vsel %vm44_vm1, %v1583_v28, 0.0 }
 0x236   :  { %v1598_v27 = vadd.f32 %v1597_v22, %v1596_v23  ;;  %v1584_v22 = vld [vmem:[#allocation2 + $0xd8] sm:$0xff] }
 0x237   :  { %v1643_v29 = vsel %vm44_vm1, %v1584_v22, 0.0 }
 0x238   :  { %v1600_v32 = vadd.f32 %v1599_v26, %v1598_v27  ;;  %v1585_v26 = vld [vmem:[#allocation2 + $0xe0] sm:$0xff] }
 0x23a   :  { %v1602_v35 = vadd.f32 %v1601_v30, %v1600_v32  ;;  %v1586_v30 = vld [vmem:[#allocation2 + $0xe8] sm:$0xff]  ;;  %v1645_v32 = vsel %vm44_vm1, %v1585_v26, 0.0 }
 0x23c   :  { %v1604_v38 = vadd.f32 %v1603_v33, %v1602_v35  ;;  %v1587_v33 = vld [vmem:[#allocation2 + $0xf0] sm:$0xff]  ;;  %v1647_v35 = vsel %vm44_vm1, %v1586_v30, 0.0 }
 0x23e   :  { %v1606_v41 = vadd.f32 %v1605_v36, %v1604_v38  ;;  %v1588_v36 = vld [vmem:[#allocation2 + $0xf8] sm:$0xff]  ;;  %v1649_v38 = vsel %vm44_vm1, %v1587_v33, 0.0 }
 0x23f   :  { %v1651_v40 = vsel %vm44_vm1, %v1588_v36, 0.0 }
 0x240   :  { %v1608_v44 = vadd.f32 %v1607_v39, %v1606_v41 }
 0x242   :  { %v1610_v47 = vadd.f32 %v1609_v42, %v1608_v44  ;;  %v688_v44 = vpop.f32.mrb[3].mxu0 }
 0x244   :  { %v1612_v50 = vadd.f32 %v1611_v45, %v1610_v47  ;;  %v1834_v45 = vpop.f32.mrb[2].mxu1  ;;  %v1893_v47 = vpop.f32.mrb[4].mxu0 }
 0x245   :  { %v325_v46 = vpop.f32.mrb[3].mxu1 }
 0x246   :  { %v1614_v53 = vadd.f32 %v1613_v48, %v1612_v50  ;;  %v698_v48 = vpop.f32.mrb[5].mxu0  ;;  %v1837_v49 = vpop.f32.mrb[4].mxu1 }
 0x247   :  { %v335_v50 = vpop.f32.mrb[5].mxu1 }
 0x248   :  { %v1616_v56 = vadd.f32 %v1615_v51, %v1614_v53  ;;  %v1896_v51 = vpop.f32.mrb[6].mxu0  ;;  %v1840_v53 = vpop.f32.mrb[6].mxu1 }
 0x249   :  { %v708_v52 = vpop.f32.mrb[7].mxu0 }
 0x24a   :  { %v1618_v59 = vadd.f32 %v1617_v54, %v1616_v56  ;;  %v345_v54 = vpop.f32.mrb[7].mxu1  ;;  %v1899_v55 = vpop.f32.mrb[8].mxu0 }
 0x24b   :  { %v718_v56 = vpop.f32.mrb[9].mxu0 }
 0x24c   :  { %v1620_v62 = vadd.f32 %v1619_v57, %v1618_v59  ;;  %v1843_v57 = vpop.f32.mrb[8].mxu1  ;;  %v1902_v59 = vpop.f32.mrb[10].mxu0 }
 0x24d   :  { %v355_v58 = vpop.f32.mrb[9].mxu1 }
 0x24e   :  { %v1622_v1 = vadd.f32 %v1621_v60, %v1620_v62  ;;  %v728_v60 = vpop.f32.mrb[11].mxu0  ;;  %v1846_v61 = vpop.f32.mrb[10].mxu1 }
 0x24f   :  { %v365_v62 = vpop.f32.mrb[11].mxu1 }
 0x250   :  { %v1624_v4 = vadd.f32 %v1623_v63, %v1622_v1  ;;  %v1905_v63 = vpop.f32.mrb[12].mxu0  ;;  %v1849_v1 = vpop.f32.mrb[12].mxu1 }
 0x251   :  { %v738_v0 = vpop.f32.mrb[13].mxu0 }
 0x252   :  { %v1626_v7 = vadd.f32 %v1625_v2, %v1624_v4  ;;  %v375_v2 = vpop.f32.mrb[13].mxu1  ;;  %v1908_v3 = vpop.f32.mrb[14].mxu0 }
 0x253   :  { %v748_v4 = vpop.f32.mrb[15].mxu0 }
 0x254   :  { %v1628_v10 = vadd.f32 %v1627_v5, %v1626_v7  ;;  %v1852_v5 = vpop.f32.mrb[14].mxu1  ;;  %v1911_v7 = vpop.f32.mrb[16].mxu0 }
 0x255   :  { %v385_v6 = vpop.f32.mrb[15].mxu1 }
 0x256   :  { %v1630_v13 = vadd.f32 %v1629_v8, %v1628_v10  ;;  %v758_v8 = vpop.f32.mrb[17].mxu0  ;;  %v1855_v9 = vpop.f32.mrb[16].mxu1 }
 0x257   :  { %v395_v10 = vpop.f32.mrb[17].mxu1 }
 0x258   :  { %v1632_v25 = vadd.f32 %v1631_v11, %v1630_v13  ;;  %v1914_v11 = vpop.f32.mrb[18].mxu0 }
 0x259   :  { %v768_v12 = vpop.f32.mrb[19].mxu0  ;;  %v1858_v13 = vpop.f32.mrb[18].mxu1 }
 0x25a   :  { %v1634_v18 = vadd.f32 %v1633_v14, %v1632_v25  ;;  %v405_v14 = vpop.f32.mrb[19].mxu1 }
 0x25b   :  { %v1917_v15 = vpop.f32.mrb[20].mxu0 }
 0x25c   :  { %v1636_v20 = vadd.f32 %v1635_v16, %v1634_v18  ;;  %v778_v25 = vpop.f32.mrb[21].mxu0 }
 0x25d   :  { %v1861_v16 = vpop.f32.mrb[20].mxu1 }
 0x25e   :  { %v1638_v23 = vadd.f32 %v1637_v19, %v1636_v20  ;;  %v415_v17 = vpop.f32.mrb[21].mxu1 }
 0x25f   :  { %v1920_v18 = vpop.f32.mrb[22].mxu0 }
 0x260   :  { %v1640_v27 = vadd.f32 %v1639_v21, %v1638_v23  ;;  %v788_v19 = vpop.f32.mrb[23].mxu0 }
 0x261   :  { %v1864_v28 = vpop.f32.mrb[22].mxu1 }
 0x262   :  { %v1642_v31 = vadd.f32 %v1641_v24, %v1640_v27  ;;  %v425_v20 = vpop.f32.mrb[23].mxu1 }
 0x263   :  { %v1923_v21 = vpop.f32.mrb[24].mxu0 }
 0x264   :  { %v1644_v34 = vadd.f32 %v1643_v29, %v1642_v31  ;;  %v798_v22 = vpop.f32.mrb[25].mxu0 }
 0x265   :  { %v1867_v23 = vpop.f32.mrb[24].mxu1 }
 0x266   :  { %v1646_v37 = vadd.f32 %v1645_v32, %v1644_v34  ;;  %v435_v24 = vpop.f32.mrb[25].mxu1 }
 0x267   :  { %v1926_v26 = vpop.f32.mrb[26].mxu0 }
 0x268   :  { %v1648_v39 = vadd.f32 %v1647_v35, %v1646_v37  ;;  %v808_v27 = vpop.f32.mrb[27].mxu0 }
 0x269   :  { %v1870_v29 = vpop.f32.mrb[26].mxu1 }
 0x26a   :  { %v1650_v41 = vadd.f32 %v1649_v38, %v1648_v39  ;;  %v445_v30 = vpop.f32.mrb[27].mxu1 }
 0x26b   :  { %v1929_v31 = vpop.f32.mrb[28].mxu0 }
 0x26c   :  { %v1652_v42 = vadd.f32 %v1651_v40, %v1650_v41  ;;  %v818_v32 = vpop.f32.mrb[29].mxu0 }
 0x26d   :  { %v1873_v33 = vpop.f32.mrb[28].mxu1 }
 0x26e   :  { %1653 = vadd.xlane.f32.xlu0 %v1652_v42  ;;  %v455_v34 = vpop.f32.mrb[29].mxu1 }
 0x26f   :  { %v1932_v35 = vpop.f32.mrb[30].mxu0 }
 0x270   :  { %v828_v36 = vpop.f32.mrb[31].mxu0 }
 0x271   :  { %v1876_v37 = vpop.f32.mrb[30].mxu1 }
 0x272   :  { %v465_v38 = vpop.f32.mrb[31].mxu1 }
 0x2fb   :  { %v1654_v39 = vpop.xlane.xlu0 %1653 }
 0x2fc   :  { %v1655_v40 = vrot.slane %v1654_v39, 4 }
 0x2fe   :  { %v1656_v41 = vadd.f32 %v1655_v40, %v1654_v39 }
 0x300   :  { %v1657_v42 = vrot.slane %v1656_v41, 2 }
 0x302   :  { %v1658_v43 = vadd.f32 %v1657_v42, %v1656_v41 }
 0x304   :  { %v1659_v44 = vrot.slane %v1658_v43, 1 }
 0x306   :  { %v1660_v45 = vadd.f32 %v1659_v44, %v1658_v43 }
 0x308   :  { %1953 = vpush %v1660_v45 }
 0x339   :  { %s1954_s11 = spop %1953 }
 0x33a   :  { %v1662_v46 = vstv %s1954_s11 }
 0x33b   :  { %1663 = vst [vmem:[#allocation3] sm:$0xff] %v1662_v46 }
 0x33c   :  { %1976 = shalt.err (!%p1973_p4)
}
 0x33d   :  { %s1977_s15 = scalar_lea.hbm %s2323_s4, 128 }
 0x33e   :  { %p1978_p5 = scmp.ne.s32.totalorder %s2323_s4, %s1977_s15  ;;  %p1981_p6 = scmp.lt.u32.totalorder %s1977_s15, %s2323_s4 }
 0x340   :  { %p1983_p7 = pnand %p1981_p6, %p1978_p5 }
 0x342   :  { %1986 = shalt.err (!%p1983_p7)
}
 0x343   :  { %1673 = dma.vmem_to_hbm [thread:$0]  %s1671_s10, 128, %s2323_s4, [#allocation4]  }
 0x344   :  { %1987 = dma.done.wait [#allocation4], 128  }
 0x345   :  { %1988 = vsyncadd [#allocation4], 4294967168 }
 0x346   :  { %1677 = vsyncpa [#allocation4], 1 }

</bundles_post_ra>
